<compile_context>
chip_gen: v7x
topology: tpu7x:2x2x1
jax: 0.10.0
libtpu: 0.0.40
codegen_flags: <defaults>
</compile_context>

<pallas_src>
import functools

import jax
import jax.numpy as jnp
from jax.experimental import pallas as pl
from jax.experimental.pallas import tpu as pltpu

_LANE = 128


def _mlp_kernel(x_ref, w1_ref, b1_ref, w2_ref, b2_ref, o_ref):
    # Layer 1: (B, d_in) @ (d_in, hidden_p) -> (B, hidden_p), f32 MXU accumulation.
    h = jnp.dot(x_ref[...], w1_ref[...], preferred_element_type=jnp.float32)
    h = jnp.maximum(h + b1_ref[...], 0.0)
    # Layer 2: (B, hidden_p) @ (hidden_p, d_out_p) -> (B, d_out_p), lane-dense store.
    y = jnp.dot(h, w2_ref[...], preferred_element_type=jnp.float32)
    o_ref[...] = jnp.maximum(y + b2_ref[...], 0.0)


def prepare_params(w1, b1, w2, b2):
    """One-time (init) weight prep.

    Transposes PyTorch (out, in) weights to canonical (K, N) layout and zero-pads:
      hidden -> hidden_p (128 lanes) so the intermediate h tile is lane-dense,
      d_out  -> d_out_p  (128 lanes) so the final store is an unmasked lane-dense vst.
    Zero-padded hidden columns stay zero through ReLU (bias also zero-padded) and the
    zero-padded w2 contraction rows contribute nothing, so semantics are unchanged.
    """
    hidden, d_in = w1.shape
    d_out = w2.shape[0]
    hidden_p = ((hidden + _LANE - 1) // _LANE) * _LANE
    d_out_p = ((d_out + _LANE - 1) // _LANE) * _LANE

    w1_t = jnp.zeros((d_in, hidden_p), jnp.float32).at[:, :hidden].set(
        w1.astype(jnp.float32).T)
    b1_p = jnp.zeros((1, hidden_p), jnp.float32).at[:, :hidden].set(
        b1.astype(jnp.float32))
    w2_t = jnp.zeros((hidden_p, d_out_p), jnp.float32).at[:hidden, :d_out].set(
        w2.astype(jnp.float32).T)
    b2_p = jnp.zeros((1, d_out_p), jnp.float32).at[:, :d_out].set(
        b2.astype(jnp.float32))
    return w1_t, b1_p, w2_t, b2_p, d_out


@functools.partial(jax.jit, static_argnames=("d_out",))
def mnist_model_nonlinear(x_nchw, w1_t, b1_p, w2_t, b2_p, *, d_out):
    """Forward pass of MNISTModelNONLinear.

    x_nchw: (B, C, H, W) float32
    w1_t:   (d_in, hidden_p)   f32  -- pre-transposed / pre-padded at init
    b1_p:   (1, hidden_p)      f32
    w2_t:   (hidden_p, d_out_p) f32
    b2_p:   (1, d_out_p)       f32
    returns: (B, d_out) float32
    """
    B = x_nchw.shape[0]
    d_in, hidden_p = w1_t.shape
    d_out_p = w2_t.shape[1]

    # nn.Flatten(): row-major flatten of all dims after batch (matches PyTorch).
    x2d = x_nchw.reshape(B, d_in)

    vmem = pl.BlockSpec(memory_space=pltpu.MemorySpace.VMEM)
    flops = 2 * B * (d_in * hidden_p + hidden_p * d_out_p)
    bytes_accessed = 4 * (B * d_in + d_in * hidden_p + hidden_p
                          + hidden_p * d_out_p + d_out_p + B * d_out_p)

    out_pad = pl.pallas_call(
        _mlp_kernel,
        out_shape=jax.ShapeDtypeStruct((B, d_out_p), jnp.float32),
        in_specs=[vmem, vmem, vmem, vmem, vmem],
        out_specs=vmem,
        cost_estimate=pl.CostEstimate(
            flops=flops, transcendentals=0, bytes_accessed=bytes_accessed),
    )(x2d, w1_t, b1_p, w2_t, b2_p)

    return out_pad[:, :d_out]


def _reference_f32(x_nchw, w1, b1, w2, b2):
    x2d = x_nchw.reshape(x_nchw.shape[0], -1)
    h = jnp.maximum(x2d @ w1.T + b1, 0.0)
    return jnp.maximum(h @ w2.T + b2, 0.0)


if __name__ == "__main__":
    # Shapes consistent with the module: input_layer = C*H*W = 4*16*16 = 1024,
    # hidden_layer = 32, output_layer = 10.
    B, C, H, W = 2, 4, 16, 16
    d_in, hidden, d_out = C * H * W, 32, 10

    key = jax.random.PRNGKey(0)
    kx, k1, k2, k3, k4 = jax.random.split(key, 5)

    x = jax.random.normal(kx, (B, C, H, W), dtype=jnp.float32)
    # Deterministic synthetic parameters (PyTorch-like uniform scaling).
    w1 = jax.random.uniform(k1, (hidden, d_in), jnp.float32, -1.0, 1.0) / jnp.sqrt(d_in)
    b1 = jax.random.uniform(k2, (hidden,), jnp.float32, -1.0, 1.0) / jnp.sqrt(d_in)
    w2 = jax.random.uniform(k3, (d_out, hidden), jnp.float32, -1.0, 1.0) / jnp.sqrt(hidden)
    b2 = jax.random.uniform(k4, (d_out,), jnp.float32, -1.0, 1.0) / jnp.sqrt(hidden)

    # One-time init-side weight prep (hoisted out of the per-call jitted path).
    w1_t, b1_p, w2_t, b2_p, d_out_s = prepare_params(w1, b1, w2, b2)
    w1_t, b1_p, w2_t, b2_p = jax.block_until_ready((w1_t, b1_p, w2_t, b2_p))

    out = mnist_model_nonlinear(x, w1_t, b1_p, w2_t, b2_p, d_out=d_out_s)
    out = jax.block_until_ready(out)

    ref = _reference_f32(x, w1, b1, w2, b2)
    assert out.shape == (B, d_out), out.shape
    # All-f32 operands with f32 accumulation -> tight tolerance vs the f32 reference.
    assert jnp.allclose(out, ref, atol=1e-3, rtol=1e-3), "mismatch vs reference"

    print("KERNEL_OK")
</pallas_src>

<mosaic_0001>
module attributes {stable_mosaic.version = 11 : i64} {
  func.func @_mlp_kernel(%arg0: memref<2x1024xf32, #tpu.memory_space<vmem>>, %arg1: memref<1024x128xf32, #tpu.memory_space<vmem>>, %arg2: memref<1x128xf32, #tpu.memory_space<vmem>>, %arg3: memref<128x128xf32, #tpu.memory_space<vmem>>, %arg4: memref<1x128xf32, #tpu.memory_space<vmem>>, %arg5: memref<2x128xf32, #tpu.memory_space<vmem>>) attributes {dimension_semantics = [], scalar_prefetch = 0 : i64, scratch_operands = 0 : i64, tpu.core_type = #tpu.core_type<tc>} {
    %c0 = arith.constant 0 : index
    %c0_0 = arith.constant 0 : index
    %0 = vector.load %arg0[%c0, %c0_0] : memref<2x1024xf32, #tpu.memory_space<vmem>>, vector<2x1024xf32>
    %c0_1 = arith.constant 0 : index
    %c0_2 = arith.constant 0 : index
    %1 = vector.load %arg1[%c0_1, %c0_2] : memref<1024x128xf32, #tpu.memory_space<vmem>>, vector<1024x128xf32>
    %cst = arith.constant dense<0.000000e+00> : vector<2x128xf32>
    %2 = tpu.matmul %0, %1, %cst {dimension_numbers = #tpu.dot_dimension_numbers<[1], [0], [0], [1], [0, 0, 1, 1], [], []>} : vector<2x1024xf32>, vector<1024x128xf32>, vector<2x128xf32> -> vector<2x128xf32>
    %c0_3 = arith.constant 0 : index
    %c0_4 = arith.constant 0 : index
    %3 = vector.load %arg2[%c0_3, %c0_4] : memref<1x128xf32, #tpu.memory_space<vmem>>, vector<1x128xf32>
    %4 = vector.broadcast %3 : vector<1x128xf32> to vector<2x128xf32>
    %5 = arith.addf %2, %4 : vector<2x128xf32>
    %cst_5 = arith.constant 0.000000e+00 : f32
    %6 = vector.broadcast %cst_5 : f32 to vector<2x128xf32>
    %7 = arith.maximumf %5, %6 : vector<2x128xf32>
    %c0_6 = arith.constant 0 : index
    %c0_7 = arith.constant 0 : index
    %8 = vector.load %arg3[%c0_6, %c0_7] : memref<128x128xf32, #tpu.memory_space<vmem>>, vector<128x128xf32>
    %cst_8 = arith.constant dense<0.000000e+00> : vector<2x128xf32>
    %9 = tpu.matmul %7, %8, %cst_8 {dimension_numbers = #tpu.dot_dimension_numbers<[1], [0], [0], [1], [0, 0, 1, 1], [], []>} : vector<2x128xf32>, vector<128x128xf32>, vector<2x128xf32> -> vector<2x128xf32>
    %c0_9 = arith.constant 0 : index
    %c0_10 = arith.constant 0 : index
    %10 = vector.load %arg4[%c0_9, %c0_10] : memref<1x128xf32, #tpu.memory_space<vmem>>, vector<1x128xf32>
    %11 = vector.broadcast %10 : vector<1x128xf32> to vector<2x128xf32>
    %12 = arith.addf %9, %11 : vector<2x128xf32>
    %cst_11 = arith.constant 0.000000e+00 : f32
    %13 = vector.broadcast %cst_11 : f32 to vector<2x128xf32>
    %14 = arith.maximumf %12, %13 : vector<2x128xf32>
    %c0_12 = arith.constant 0 : index
    %c0_13 = arith.constant 0 : index
    %15 = vector.load %arg5[%c0_12, %c0_13] : memref<2x128xf32, #tpu.memory_space<vmem>>, vector<2x128xf32>
    tpu.vector_store %arg5[%c0_12, %c0_13], %14 {strides = array<i32>} : memref<2x128xf32, #tpu.memory_space<vmem>>, vector<2x128xf32>,
    return
  }
}

</mosaic_0001>

<bundles_post_ra>
// kernel: mnist_model_nonlinear.1
= control target key start
LH: loop header
LB: loop body
LE: loop exit
PB: predicated region body
PF: predicated region fallthrough
CT: control target
= control target key end

     0   :  { %10 = vsyncpa [#allocation3], 0  ;;  %s1144_s0 = inlined_call_operand.vmem [shape: f32[2,1024], index: 0, kind: input, shape index: {}]   ;;  %s1145_s1 = inlined_call_operand.hbm [shape: f32[1024,128], index: 1, kind: input, shape index: {}]   ;;  %s1146_s2 = inlined_call_operand.vmem [shape: f32[1,128], index: 2, kind: input, shape index: {}]   ;;  %s1147_s3 = inlined_call_operand.vmem [shape: f32[128,128], index: 3, kind: input, shape index: {}]   ;;  %s1148_s4 = inlined_call_operand.vmem [shape: f32[1,128], index: 4, kind: input, shape index: {}]   ;;  %s1149_s5 = inlined_call_operand.hbm [shape: f32[2,128], index: 5, kind: output, shape index: {}]  }
   0x1   :  { %11 = vsyncpa [#allocation4], 0  ;;  %s1011_s18 = smov [#allocation2]   ;;  %s963_s22 = scalar_lea.hbm %s1145_s1, 16384 }
   0x2   :  { %s19_s19 = sshll.u32 %s1011_s18, 4  ;;  %p964_p0 = scmp.ne.s32.totalorder %s1145_s1, %s963_s22  ;;  %s20_s19 = int_to_ptr.vmem [resolvable:$true] %s19_s19 }
   0x3   :  { %p967_p1 = scmp.lt.u32.totalorder %s963_s22, %s1145_s1 }
   0x5   :  { %p969_p2 = pnand %p967_p1, %p964_p0 }
   0x7   :  { %972 = shalt.err (!%p969_p2)
}
   0x8   :  { %s973_s27 = scalar_lea.vmem %s20_s19, 16384  ;;  %p978_p4 = scmp.lt.s32.totalorder %s20_s19, %s20_s19 }
   0x9   :  { %p974_p3 = scmp.ne.s32.totalorder %s20_s19, %s973_s27  ;;  %p979_p5 = scmp.lt.s32.totalorder %s973_s27, %s973_s27 }
   0xb   :  { %p980_p6 = por %p979_p5, %p978_p4 }
   0xd   :  { %p981_p7 = pnand %p980_p6, %p974_p3 }
   0xf   :  { %984 = shalt.err (!%p981_p7)
}
  0x10   :  { %s1012_s28 = smov 128   ;;  %s1013_s29 = smov 8  }
  0x11   :  { %25 = dma.hbm_to_vmem [thread:$0]  %s1145_s1, 16384, %s20_s19, [#allocation3], %s1012_s28, %s1012_s28, %s1013_s29  }
  0x12   :  { %1007 = dma.done.wait [#allocation3], 16384  }
  0x13   :  { %1008 = vsyncadd [#allocation3], 4294950912  ;;  %v53_v0 = vld [vmem:[#allocation2 + $0x80] sm:$0xff]  ;;  %v54_v1 = vld [vmem:[#allocation2 + $0x88] sm:$0xff]  ;;  %v1014_v47 = vmov 1983009808   ;;  %v178_v49 = vlaneseq }
  0x14   :  { %v37_v2 = vld [vmem:[#allocation2] sm:$0xff]  ;;  %v801_v3 = vpack.c.bf16 %v54_v1, %v53_v0  ;;  %v38_v4 = vld [vmem:[#allocation2 + $0x8] sm:$0xff]  ;;  %v55_v11 = vld [vmem:[#allocation2 + $0x90] sm:$0xff]  ;;  %v176_v48 = vunpack.c.l.s4 %v1014_v47  ;;  %vm1016_vm0 = vmmov 0  }
  0x15   :  { %v85_v5 = vld [vmem:[#allocation2 + $0x180] sm:$0xff]  ;;  %v86_v6 = vld [vmem:[#allocation2 + $0x188] sm:$0xff]  ;;  %v803_v7 = vpack.c.bf16 %v38_v4, %v37_v2  ;;  %v56_v13 = vld [vmem:[#allocation2 + $0x98] sm:$0xff]  ;;  %v179_v0 = vshrl.u32 %v178_v49, 7 }
  0x16   :  { %v833_v8 = vpack.c.bf16 %v86_v6, %v85_v5  ;;  %v69_v9 = vld [vmem:[#allocation2 + $0x100] sm:$0xff]  ;;  %v70_v10 = vld [vmem:[#allocation2 + $0x108] sm:$0xff]  ;;  %802 = vmatprep.subr.bf16.mxu0 %v801_v3  ;;  %v39_v14 = vld [vmem:[#allocation2 + $0x10] sm:$0xff]  ;;  %v805_v16 = vpack.c.bf16 %v56_v13, %v55_v11  ;;  %v177_v63 = vunpack.c.0.s8 %v176_v48 }
  0x17   :  { %v835_v12 = vpack.c.bf16 %v70_v10, %v69_v9  ;;  %v40_v15 = vld [vmem:[#allocation2 + $0x18] sm:$0xff]  ;;  %804 = vmatpush3.bf16.msra.mxu0 %v803_v7  ;;  %v87_v18 = vld [vmem:[#allocation2 + $0x190] sm:$0xff]  ;;  %v57_v23 = vld [vmem:[#allocation2 + $0xa0] sm:$0xff] }
  0x18   :  { %834 = vmatprep.subr.bf16.mxu1 %v833_v8  ;;  %v807_v17 = vpack.c.bf16 %v40_v15, %v39_v14  ;;  %v88_v19 = vld [vmem:[#allocation2 + $0x198] sm:$0xff]  ;;  %v71_v20 = vld [vmem:[#allocation2 + $0x110] sm:$0xff]  ;;  %v58_v24 = vld [vmem:[#allocation2 + $0xa8] sm:$0xff]  ;;  %806 = vmatprep.subr.bf16.mxu0 %v805_v16  ;;  %v1061_v13 = vsub.s32 %v177_v63, %v179_v0 }
  0x19   :  { %836 = vmatpush3.bf16.msra.mxu1 %v835_v12  ;;  %v837_v21 = vpack.c.bf16 %v88_v19, %v87_v18  ;;  %v72_v22 = vld [vmem:[#allocation2 + $0x118] sm:$0xff]  ;;  %v809_v26 = vpack.c.bf16 %v58_v24, %v57_v23  ;;  %v41_v27 = vld [vmem:[#allocation2 + $0x20] sm:$0xff]  ;;  %v42_v28 = vld [vmem:[#allocation2 + $0x28] sm:$0xff] }
  0x1a   :  { %v839_v25 = vpack.c.bf16 %v72_v22, %v71_v20  ;;  %v89_v29 = vld [vmem:[#allocation2 + $0x1a0] sm:$0xff]  ;;  %v90_v30 = vld [vmem:[#allocation2 + $0x1a8] sm:$0xff]  ;;  %v811_v33 = vpack.c.bf16 %v42_v28, %v41_v27  ;;  %v59_v35 = vld [vmem:[#allocation2 + $0xb0] sm:$0xff] }
  0x1b   :  { %838 = vmatprep.subr.bf16.mxu1 %v837_v21  ;;  %v73_v31 = vld [vmem:[#allocation2 + $0x120] sm:$0xff]  ;;  %v74_v32 = vld [vmem:[#allocation2 + $0x128] sm:$0xff]  ;;  %808 = vmatpush3.bf16.msra.mxu0 %v807_v17  ;;  %v841_v34 = vpack.c.bf16 %v90_v30, %v89_v29  ;;  %v60_v36 = vld [vmem:[#allocation2 + $0xb8] sm:$0xff] }
  0x1c   :  { %v43_v37 = vld [vmem:[#allocation2 + $0x30] sm:$0xff]  ;;  %810 = vmatprep.subr.bf16.mxu0 %v809_v26  ;;  %v843_v38 = vpack.c.bf16 %v74_v32, %v73_v31  ;;  %v813_v39 = vpack.c.bf16 %v60_v36, %v59_v35  ;;  %v44_v40 = vld [vmem:[#allocation2 + $0x38] sm:$0xff]  ;;  %v61_v46 = vld [vmem:[#allocation2 + $0xc0] sm:$0xff] }
  0x1d   :  { %840 = vmatpush3.bf16.msra.mxu1 %v839_v25  ;;  %v91_v41 = vld [vmem:[#allocation2 + $0x1b0] sm:$0xff]  ;;  %v92_v42 = vld [vmem:[#allocation2 + $0x1b8] sm:$0xff]  ;;  %v62_v50 = vld [vmem:[#allocation2 + $0xc8] sm:$0xff]  ;;  %v815_v51 = vpack.c.bf16 %v44_v40, %v43_v37 }
  0x1e   :  { %842 = vmatprep.subr.bf16.mxu1 %v841_v34  ;;  %v845_v43 = vpack.c.bf16 %v92_v42, %v91_v41  ;;  %v75_v44 = vld [vmem:[#allocation2 + $0x130] sm:$0xff]  ;;  %v76_v45 = vld [vmem:[#allocation2 + $0x138] sm:$0xff]  ;;  %v93_v52 = vld [vmem:[#allocation2 + $0x1c0] sm:$0xff]  ;;  %v817_v55 = vpack.c.bf16 %v62_v50, %v61_v46 }
  0x1f   :  { %812 = vmatpush3.bf16.msra.mxu0 %v811_v33  ;;  %v94_v53 = vld [vmem:[#allocation2 + $0x1c8] sm:$0xff]  ;;  %v847_v54 = vpack.c.bf16 %v76_v45, %v75_v44  ;;  %v45_v56 = vld [vmem:[#allocation2 + $0x40] sm:$0xff]  ;;  %v63_v61 = vld [vmem:[#allocation2 + $0xd0] sm:$0xff] }
  0x20   :  { %814 = vmatprep.subr.bf16.mxu0 %v813_v39  ;;  %v46_v57 = vld [vmem:[#allocation2 + $0x48] sm:$0xff]  ;;  %v77_v58 = vld [vmem:[#allocation2 + $0x140] sm:$0xff]  ;;  %v849_v59 = vpack.c.bf16 %v94_v53, %v93_v52  ;;  %v64_v62 = vld [vmem:[#allocation2 + $0xd8] sm:$0xff] }
  0x21   :  { %844 = vmatpush3.bf16.msra.mxu1 %v843_v38  ;;  %v78_v60 = vld [vmem:[#allocation2 + $0x148] sm:$0xff]  ;;  %v95_v1 = vld [vmem:[#allocation2 + $0x1d0] sm:$0xff]  ;;  %v96_v2 = vld [vmem:[#allocation2 + $0x1d8] sm:$0xff]  ;;  %v819_v3 = vpack.c.bf16 %v46_v57, %v45_v56  ;;  %v821_v5 = vpack.c.bf16 %v64_v62, %v63_v61 }
  0x22   :  { %846 = vmatprep.subr.bf16.mxu1 %v845_v43  ;;  %v851_v4 = vpack.c.bf16 %v78_v60, %v77_v58  ;;  %v47_v6 = vld [vmem:[#allocation2 + $0x50] sm:$0xff]  ;;  %v48_v7 = vld [vmem:[#allocation2 + $0x58] sm:$0xff]  ;;  %v853_v9 = vpack.c.bf16 %v96_v2, %v95_v1  ;;  %v65_v11 = vld [vmem:[#allocation2 + $0xe0] sm:$0xff] }
  0x23   :  { %816 = vmatpush3.bf16.msra.mxu0 %v815_v51  ;;  %v79_v8 = vld [vmem:[#allocation2 + $0x150] sm:$0xff]  ;;  %v80_v10 = vld [vmem:[#allocation2 + $0x158] sm:$0xff]  ;;  %v66_v12 = vld [vmem:[#allocation2 + $0xe8] sm:$0xff]  ;;  %v823_v16 = vpack.c.bf16 %v48_v7, %v47_v6 }
  0x24   :  { %818 = vmatprep.subr.bf16.mxu0 %v817_v55  ;;  %v97_v14 = vld [vmem:[#allocation2 + $0x1e0] sm:$0xff]  ;;  %v98_v15 = vld [vmem:[#allocation2 + $0x1e8] sm:$0xff]  ;;  %v855_v18 = vpack.c.bf16 %v80_v10, %v79_v8  ;;  %v825_v19 = vpack.c.bf16 %v66_v12, %v65_v11  ;;  %v67_v25 = vld [vmem:[#allocation2 + $0xf0] sm:$0xff] }
  0x25   :  { %848 = vmatpush3.bf16.msra.mxu1 %v847_v54  ;;  %v49_v17 = vld [vmem:[#allocation2 + $0x60] sm:$0xff]  ;;  %v50_v20 = vld [vmem:[#allocation2 + $0x68] sm:$0xff]  ;;  %v857_v23 = vpack.c.bf16 %v98_v15, %v97_v14  ;;  %v68_v26 = vld [vmem:[#allocation2 + $0xf8] sm:$0xff] }
  0x26   :  { %850 = vmatprep.subr.bf16.mxu1 %v849_v59  ;;  %v81_v21 = vld [vmem:[#allocation2 + $0x160] sm:$0xff]  ;;  %v82_v24 = vld [vmem:[#allocation2 + $0x168] sm:$0xff]  ;;  %v99_v29 = vld [vmem:[#allocation2 + $0x1f0] sm:$0xff]  ;;  %v827_v31 = vpack.c.bf16 %v50_v20, %v49_v17  ;;  %v829_v35 = vpack.c.bf16 %v68_v26, %v67_v25 }
  0x27   :  { %820 = vmatpush3.bf16.msra.mxu0 %v819_v3  ;;  %v35_v22 = vld [vmem:[%s1144_s0] sm:$0xff]  ;;  %v100_v30 = vld [vmem:[#allocation2 + $0x1f8] sm:$0xff]  ;;  %v859_v34 = vpack.c.bf16 %v82_v24, %v81_v21  ;;  %v51_v36 = vld [vmem:[#allocation2 + $0x70] sm:$0xff] }
  0x28   :  { %822 = vmatprep.subr.bf16.mxu0 %v821_v5  ;;  %v181_v27 = vrot.slane %v35_v22, %v1061_v13  ;;  %v174_v28 = vcombine.high %v35_v22, %v35_v22  ;;  %v52_v37 = vld [vmem:[#allocation2 + $0x78] sm:$0xff]  ;;  %v83_v38 = vld [vmem:[#allocation2 + $0x170] sm:$0xff]  ;;  %v861_v39 = vpack.c.bf16 %v100_v30, %v99_v29  ;;  %v117_v41 = vld [vmem:[#allocation2 + $0x280] sm:$0xff] }
  0x29   :  { %852 = vmatpush3.bf16.msra.mxu1 %v851_v4  ;;  %v84_v40 = vld [vmem:[#allocation2 + $0x178] sm:$0xff]  ;;  %v118_v42 = vld [vmem:[#allocation2 + $0x288] sm:$0xff]  ;;  %v149_v44 = vld [vmem:[#allocation2 + $0x380] sm:$0xff]  ;;  %v831_v46 = vpack.c.bf16 %v52_v37, %v51_v36 }
  0x2a   :  { %854 = vmatprep.subr.bf16.mxu1 %v853_v9  ;;  %v189_v32 = vcombine.high %v181_v27, %v181_v27  ;;  %v188_v33 = vrot.slane %v174_v28, %v1061_v13  ;;  %v150_v45 = vld [vmem:[#allocation2 + $0x388] sm:$0xff]  ;;  %v863_v47 = vpack.c.bf16 %v84_v40, %v83_v38  ;;  %v865_v48 = vpack.c.bf16 %v118_v42, %v117_v41  ;;  %v101_v49 = vld [vmem:[#allocation2 + $0x200] sm:$0xff]  ;;  %v119_v54 = vld [vmem:[#allocation2 + $0x290] sm:$0xff] }
  0x2b   :  { %824 = vmatpush3.bf16.msra.mxu0 %v823_v16  ;;  %v102_v50 = vld [vmem:[#allocation2 + $0x208] sm:$0xff]  ;;  %v133_v51 = vld [vmem:[#allocation2 + $0x300] sm:$0xff]  ;;  %v897_v52 = vpack.c.bf16 %v150_v45, %v149_v44  ;;  %v120_v55 = vld [vmem:[#allocation2 + $0x298] sm:$0xff] }
  0x2c   :  { %826 = vmatprep.subr.bf16.mxu0 %v825_v19  ;;  %280 = vmatprep.mubr.f32.mxu0 %v189_v32  ;;  %v190_v43 = vcombine.high %v188_v33, %v188_v33  ;;  %v134_v53 = vld [vmem:[#allocation2 + $0x308] sm:$0xff]  ;;  %v151_v56 = vld [vmem:[#allocation2 + $0x390] sm:$0xff]  ;;  %v152_v57 = vld [vmem:[#allocation2 + $0x398] sm:$0xff]  ;;  %v867_v58 = vpack.c.bf16 %v102_v50, %v101_v49  ;;  %v869_v60 = vpack.c.bf16 %v120_v55, %v119_v54 }
  0x2d   :  { %856 = vmatpush3.bf16.msra.mxu1 %v855_v18  ;;  %v899_v59 = vpack.c.bf16 %v134_v53, %v133_v51  ;;  %v103_v61 = vld [vmem:[#allocation2 + $0x210] sm:$0xff]  ;;  %v104_v62 = vld [vmem:[#allocation2 + $0x218] sm:$0xff]  ;;  %v901_v0 = vpack.c.bf16 %v152_v57, %v151_v56  ;;  %v121_v2 = vld [vmem:[#allocation2 + $0x2a0] sm:$0xff] }
  0x2e   :  { %858 = vmatprep.subr.bf16.mxu1 %v857_v23  ;;  %350 = vmatprep.mubr.f32.mxu1 %v190_v43  ;;  %v135_v63 = vld [vmem:[#allocation2 + $0x310] sm:$0xff]  ;;  %v136_v1 = vld [vmem:[#allocation2 + $0x318] sm:$0xff]  ;;  %v122_v3 = vld [vmem:[#allocation2 + $0x2a8] sm:$0xff]  ;;  %v871_v6 = vpack.c.bf16 %v104_v62, %v103_v61 }
  0x2f   :  { %828 = vmatpush3.bf16.msra.mxu0 %v827_v31  ;;  %v153_v4 = vld [vmem:[#allocation2 + $0x3a0] sm:$0xff]  ;;  %v154_v5 = vld [vmem:[#allocation2 + $0x3a8] sm:$0xff]  ;;  %v903_v7 = vpack.c.bf16 %v136_v1, %v135_v63  ;;  %v873_v8 = vpack.c.bf16 %v122_v3, %v121_v2  ;;  %v123_v15 = vld [vmem:[#allocation2 + $0x2b0] sm:$0xff] }
  0x30   :  { %830 = vmatprep.subr.bf16.mxu0 %v829_v35  ;;  %v105_v9 = vld [vmem:[#allocation2 + $0x220] sm:$0xff]  ;;  %v106_v10 = vld [vmem:[#allocation2 + $0x228] sm:$0xff]  ;;  %v905_v12 = vpack.c.bf16 %v154_v5, %v153_v4  ;;  %v124_v16 = vld [vmem:[#allocation2 + $0x2b8] sm:$0xff] }
  0x31   :  { %860 = vmatpush3.bf16.msra.mxu1 %v859_v34  ;;  %v137_v11 = vld [vmem:[#allocation2 + $0x320] sm:$0xff]  ;;  %v138_v14 = vld [vmem:[#allocation2 + $0x328] sm:$0xff]  ;;  %v155_v17 = vld [vmem:[#allocation2 + $0x3b0] sm:$0xff]  ;;  %v875_v19 = vpack.c.bf16 %v106_v10, %v105_v9  ;;  %v877_v21 = vpack.c.bf16 %v124_v16, %v123_v15 }
  0x32   :  { %862 = vmatprep.subr.bf16.mxu1 %v861_v39  ;;  %v156_v18 = vld [vmem:[#allocation2 + $0x3b8] sm:$0xff]  ;;  %v907_v20 = vpack.c.bf16 %v138_v14, %v137_v11  ;;  %v107_v22 = vld [vmem:[#allocation2 + $0x230] sm:$0xff]  ;;  %v126_v28 = vld [vmem:[#allocation2 + $0x2c8] sm:$0xff] }
  0x33   :  { %832 = vmatpush3.bf16.msra.mxu0 %v831_v46  ;;  %v108_v23 = vld [vmem:[#allocation2 + $0x238] sm:$0xff]  ;;  %v139_v24 = vld [vmem:[#allocation2 + $0x330] sm:$0xff]  ;;  %v909_v25 = vpack.c.bf16 %v156_v18, %v155_v17  ;;  %v157_v29 = vld [vmem:[#allocation2 + $0x3c0] sm:$0xff] }
  0x34   :  { %866 = vmatprep.subr.bf16.mxu0 %v865_v48  ;;  %v140_v26 = vld [vmem:[#allocation2 + $0x338] sm:$0xff]  ;;  %v158_v30 = vld [vmem:[#allocation2 + $0x3c8] sm:$0xff]  ;;  %v879_v32 = vpack.c.bf16 %v108_v23, %v107_v22  ;;  %v109_v37 = vld [vmem:[#allocation2 + $0x240] sm:$0xff]  ;;  %v1015_v22 = vmov 0.0|0.0  }
  0x35   :  { %864 = vmatpush3.bf16.msra.mxu1 %v863_v47  ;;  %v36_v31 = vld [vmem:[%s1144_s0 + $0x8] sm:$0xff]  ;;  %v911_v35 = vpack.c.bf16 %v140_v26, %v139_v24  ;;  %v141_v39 = vld [vmem:[#allocation2 + $0x340] sm:$0xff]  ;;  %v913_v40 = vpack.c.bf16 %v158_v30, %v157_v29  ;;  %v127_v42 = vld [vmem:[#allocation2 + $0x2d0] sm:$0xff] }
  0x36   :  { %898 = vmatprep.subr.bf16.mxu1 %v897_v52  ;;  %281 = vmatmul.mubr.f32.vlgmr.msra.gmra.mrb[0].mxu0 %v181_v27  ;;  %v125_v27 = vld [vmem:[#allocation2 + $0x2c0] sm:$0xff]  ;;  %v191_v34 = vcombine.high %v36_v31, %v36_v31  ;;  %v110_v38 = vld [vmem:[#allocation2 + $0x248] sm:$0xff]  ;;  %v128_v43 = vld [vmem:[#allocation2 + $0x2d8] sm:$0xff] }
  0x37   :  { %868 = vmatpush3.bf16.msra.mxu0 %v867_v58  ;;  %v881_v36 = vpack.c.bf16 %v126_v28, %v125_v27  ;;  %v142_v41 = vld [vmem:[#allocation2 + $0x348] sm:$0xff]  ;;  %v159_v46 = vld [vmem:[#allocation2 + $0x3d0] sm:$0xff]  ;;  %v160_v47 = vld [vmem:[#allocation2 + $0x3d8] sm:$0xff]  ;;  %v883_v48 = vpack.c.bf16 %v110_v38, %v109_v37  ;;  %v885_v51 = vpack.c.bf16 %v128_v43, %v127_v42 }
  0x38   :  { %351 = vmatmul.mubr.f32.vlgmr.msra.gmra.mrb[0].mxu1 %v188_v33  ;;  %870 = vmatprep.subr.bf16.mxu0 %v869_v60  ;;  %v1072_v33 = vrot.slane %v36_v31, %v1061_v13  ;;  %v205_v45 = vrot.slane %v191_v34, %v1061_v13  ;;  %v915_v50 = vpack.c.bf16 %v142_v41, %v141_v39  ;;  %v111_v52 = vld [vmem:[#allocation2 + $0x250] sm:$0xff]  ;;  %v112_v53 = vld [vmem:[#allocation2 + $0x258] sm:$0xff]  ;;  %v129_v57 = vld [vmem:[#allocation2 + $0x2e0] sm:$0xff] }
  0x39   :  { %900 = vmatpush3.bf16.msra.mxu1 %v899_v59  ;;  %v143_v54 = vld [vmem:[#allocation2 + $0x350] sm:$0xff]  ;;  %v917_v55 = vpack.c.bf16 %v160_v47, %v159_v46  ;;  %v144_v56 = vld [vmem:[#allocation2 + $0x358] sm:$0xff]  ;;  %v130_v58 = vld [vmem:[#allocation2 + $0x2e8] sm:$0xff]  ;;  %v887_v60 = vpack.c.bf16 %v112_v53, %v111_v52 }
  0x3a   :  { %902 = vmatprep.subr.bf16.mxu1 %v901_v0  ;;  %v206_v44 = vcombine.high %v1072_v33, %v1072_v33  ;;  %v207_v49 = vcombine.high %v205_v45, %v205_v45  ;;  %v161_v13 = vld [vmem:[#allocation2 + $0x3e0] sm:$0xff]  ;;  %v162_v59 = vld [vmem:[#allocation2 + $0x3e8] sm:$0xff]  ;;  %v919_v61 = vpack.c.bf16 %v144_v56, %v143_v54  ;;  %v889_v62 = vpack.c.bf16 %v130_v58, %v129_v57  ;;  %v131_v4 = vld [vmem:[#allocation2 + $0x2f0] sm:$0xff] }
  0x3b   :  { %872 = vmatpush3.bf16.msra.mxu0 %v871_v6  ;;  %v113_v63 = vld [vmem:[#allocation2 + $0x260] sm:$0xff]  ;;  %v114_v0 = vld [vmem:[#allocation2 + $0x268] sm:$0xff]  ;;  %v921_v2 = vpack.c.bf16 %v162_v59, %v161_v13  ;;  %v132_v5 = vld [vmem:[#allocation2 + $0x2f8] sm:$0xff] }
  0x3c   :  { %874 = vmatprep.subr.bf16.mxu0 %v873_v8  ;;  %420 = vmatprep.mubr.f32.mxu0 %v206_v44  ;;  %v145_v1 = vld [vmem:[#allocation2 + $0x360] sm:$0xff]  ;;  %v146_v3 = vld [vmem:[#allocation2 + $0x368] sm:$0xff]  ;;  %v163_v6 = vld [vmem:[#allocation2 + $0x3f0] sm:$0xff]  ;;  %v891_v8 = vpack.c.bf16 %v114_v0, %v113_v63  ;;  %v893_v10 = vpack.c.bf16 %v132_v5, %v131_v4  ;;  %v1017_v44 = vmov 0.0  }
  0x3d   :  { %904 = vmatpush3.bf16.msra.mxu1 %v903_v7  ;;  %490 = vmatprep.mubr.f32.mxu1 %v207_v49  ;;  %v164_v7 = vld [vmem:[#allocation2 + $0x3f8] sm:$0xff]  ;;  %v923_v9 = vpack.c.bf16 %v146_v3, %v145_v1  ;;  %v115_v11 = vld [vmem:[#allocation2 + $0x270] sm:$0xff]  ;;  %v501_v26 = vld [vmem:[%s1147_s3 + $0x20] sm:$0xff] }
  0x3e   :  { %906 = vmatprep.subr.bf16.mxu1 %v905_v12  ;;  %v116_v12 = vld [vmem:[#allocation2 + $0x278] sm:$0xff]  ;;  %v925_v14 = vpack.c.bf16 %v164_v7, %v163_v6  ;;  %v147_v15 = vld [vmem:[#allocation2 + $0x370] sm:$0xff]  ;;  %v502_v27 = vld [vmem:[%s1147_s3 + $0x28] sm:$0xff] }
  0x3f   :  { %876 = vmatpush3.bf16.msra.mxu0 %v875_v19  ;;  %v148_v16 = vld [vmem:[#allocation2 + $0x378] sm:$0xff]  ;;  %v895_v17 = vpack.c.bf16 %v116_v12, %v115_v11  ;;  %v497_v19 = vld [vmem:[%s1147_s3] sm:$0xff]  ;;  %v936_v28 = vpack.c.bf16 %v502_v27, %v501_v26  ;;  %v503_v29 = vld [vmem:[%s1147_s3 + $0x30] sm:$0xff] }
  0x40   :  { %878 = vmatprep.subr.bf16.mxu0 %v877_v21  ;;  %v927_v18 = vpack.c.bf16 %v148_v16, %v147_v15  ;;  %v499_v21 = vld [vmem:[%s1147_s3 + $0x10] sm:$0xff]  ;;  %v500_v24 = vld [vmem:[%s1147_s3 + $0x18] sm:$0xff]  ;;  %v509_v38 = vld [vmem:[%s1147_s3 + $0x60] sm:$0xff] }
  0x41   :  { %908 = vmatpush3.bf16.msra.mxu1 %v907_v20  ;;  %v498_v20 = vld [vmem:[%s1147_s3 + $0x8] sm:$0xff]  ;;  %v504_v30 = vld [vmem:[%s1147_s3 + $0x38] sm:$0xff]  ;;  %v511_v41 = vld [vmem:[%s1147_s3 + $0x70] sm:$0xff] }
  0x42   :  { %910 = vmatprep.subr.bf16.mxu1 %v909_v25  ;;  %v930_v23 = vpack.c.bf16 %v498_v20, %v497_v19  ;;  %v933_v25 = vpack.c.bf16 %v500_v24, %v499_v21  ;;  %v939_v31 = vpack.c.bf16 %v504_v30, %v503_v29  ;;  %v510_v39 = vld [vmem:[%s1147_s3 + $0x68] sm:$0xff]  ;;  %v512_v42 = vld [vmem:[%s1147_s3 + $0x78] sm:$0xff]  ;;  %v607_v46 = vld [vmem:[%s1146_s2] ss:$0 sm:$0xff]  ;;  %s1018_s2 = smov [#allocation5]  }
  0x43   :  { %880 = vmatpush3.bf16.msra.mxu0 %v879_v32  ;;  %v505_v32 = vld [vmem:[%s1147_s3 + $0x40] sm:$0xff]  ;;  %v951_v43 = vpack.c.bf16 %v512_v42, %v511_v41  ;;  %s598_s17 = sshll.u32 %s1018_s2, 4  ;;  %s599_s17 = int_to_ptr.vmem [resolvable:$true] %s598_s17 }
  0x44   :  { %882 = vmatprep.subr.bf16.mxu0 %v881_v36  ;;  %v508_v36 = vld [vmem:[%s1147_s3 + $0x58] sm:$0xff]  ;;  %s985_s18 = scalar_lea.vmem %s599_s17, 32  ;;  %p990_p9 = scmp.lt.s32.totalorder %s599_s17, %s599_s17 }
  0x45   :  { %912 = vmatpush3.bf16.msra.mxu1 %v911_v35  ;;  %v507_v35 = vld [vmem:[%s1147_s3 + $0x50] sm:$0xff]  ;;  %p986_p8 = scmp.ne.s32.totalorder %s599_s17, %s985_s18  ;;  %p991_p10 = scmp.lt.s32.totalorder %s985_s18, %s985_s18 }
  0x46   :  { %914 = vmatprep.subr.bf16.mxu1 %v913_v40  ;;  %v945_v37 = vpack.c.bf16 %v508_v36, %v507_v35  ;;  %v948_v40 = vpack.c.bf16 %v510_v39, %v509_v38 }
  0x47   :  { %884 = vmatpush3.bf16.msra.mxu0 %v883_v48  ;;  %p992_p11 = por %p991_p10, %p990_p9 }
  0x48   :  { %886 = vmatprep.subr.bf16.mxu0 %v885_v51 }
  0x49   :  { %916 = vmatpush3.bf16.msra.mxu1 %v915_v50  ;;  %p993_p12 = pnand %p992_p11, %p986_p8 }
  0x4a   :  { %918 = vmatprep.subr.bf16.mxu1 %v917_v55 }
  0x4b   :  { %888 = vmatpush3.bf16.msra.mxu0 %v887_v60 }
  0x4c   :  { %890 = vmatprep.subr.bf16.mxu0 %v889_v62  ;;  %v608_v62 = vld [vmem:[%s1148_s4] ss:$0 sm:$0xff] }
  0x4d   :  { %920 = vmatpush3.bf16.msra.mxu1 %v919_v61 }
  0x4e   :  { %922 = vmatprep.subr.bf16.mxu1 %v921_v2 }
  0x4f   :  { %892 = vmatpush3.bf16.msra.mxu0 %v891_v8 }
  0x50   :  { %894 = vmatprep.subr.bf16.mxu0 %v893_v10 }
  0x51   :  { %924 = vmatpush3.bf16.msra.mxu1 %v923_v9 }
  0x52   :  { %926 = vmatprep.subr.bf16.mxu1 %v925_v14 }
  0x53   :  { %896 = vmatpush3.bf16.msra.mxu0 %v895_v17 }
  0x54   :  { %929 = vmatprep.subr.bf16.mxu0 %v1015_v22 }
  0x55   :  { %928 = vmatpush3.bf16.msra.mxu1 %v927_v18 }
  0x56   :  { %421 = vmatmul.mubr.f32.vlgmr.msra.gmra.mrb[2].mxu0 %v1072_v33  ;;  %v506_v33 = vld [vmem:[%s1147_s3 + $0x48] sm:$0xff] }
  0x57   :  { %931 = vmatpush3.bf16.msra.mxu0 %v930_v23  ;;  %v942_v34 = vpack.c.bf16 %v506_v33, %v505_v32  ;;  %798 = vmatprep.mubr.msk.f32.mxu0 %vm1016_vm0, %v1017_v44 }
  0x58   :  { %491 = vmatmul.mubr.f32.vlgmr.msra.gmra.mrb[2].mxu1 %v205_v45  ;;  %932 = vmatprep.subr.bf16.mxu0 %v1015_v22 }
  0x5b   :  { %934 = vmatpush3.bf16.msra.mxu0 %v933_v25 }
  0x5c   :  { %935 = vmatprep.subr.bf16.mxu0 %v1015_v22 }
  0x5f   :  { %937 = vmatpush3.bf16.msra.mxu0 %v936_v28 }
  0x60   :  { %938 = vmatprep.subr.bf16.mxu0 %v1015_v22 }
  0x63   :  { %940 = vmatpush3.bf16.msra.mxu0 %v939_v31 }
  0x64   :  { %941 = vmatprep.subr.bf16.mxu0 %v1015_v22 }
  0x67   :  { %943 = vmatpush3.bf16.msra.mxu0 %v942_v34 }
  0x68   :  { %944 = vmatprep.subr.bf16.mxu0 %v1015_v22 }
  0x6b   :  { %946 = vmatpush3.bf16.msra.mxu0 %v945_v37 }
  0x6c   :  { %947 = vmatprep.subr.bf16.mxu0 %v1015_v22 }
  0x6f   :  { %949 = vmatpush3.bf16.msra.mxu0 %v948_v40 }
  0x70   :  { %950 = vmatprep.subr.bf16.mxu0 %v1015_v22 }
  0x73   :  { %952 = vmatpush3.bf16.msra.mxu0 %v951_v43 }
 0x109   :  { %v641_v45 = vpop.f32.mrb[0].mxu0 }
 0x10a   :  { %v642_v47 = vpop.f32.mrb[1].mxu0 }
 0x10b   :  { %v676_v48 = vpop.f32.mrb[0].mxu1  ;;  %v643_v49 = vadd.f32 %v642_v47, %v641_v45 }
 0x10c   :  { %v677_v50 = vpop.f32.mrb[1].mxu1 }
 0x10d   :  { %v678_v51 = vadd.f32 %v677_v50, %v676_v48  ;;  %v283_v52 = vadd.f32 %v643_v49, %v607_v46 }
 0x10f   :  { %v353_v53 = vadd.f32 %v678_v51, %v283_v52 }
 0x129   :  { %v711_v54 = vpop.f32.mrb[2].mxu0 }
 0x12a   :  { %v712_v55 = vpop.f32.mrb[3].mxu0 }
 0x12b   :  { %v746_v56 = vpop.f32.mrb[2].mxu1  ;;  %v713_v57 = vadd.f32 %v712_v55, %v711_v54 }
 0x12c   :  { %v747_v58 = vpop.f32.mrb[3].mxu1 }
 0x12d   :  { %v748_v13 = vadd.f32 %v747_v58, %v746_v56  ;;  %v423_v59 = vadd.f32 %v713_v57, %v353_v53 }
 0x12f   :  { %v493_v60 = vadd.f32 %v748_v13, %v423_v59 }
 0x131   :  { %v496_v61 = vmax.f32 %v493_v60, 0.0 }
 0x133   :  { %799 = vmatmul.mubr.f32.vlgmr.msra.gmra.mrb[4].mxu0 %v496_v61 }
 0x206   :  { %v586_v63 = vpop.f32.mrb[4].mxu0 }
 0x207   :  { %v587_v0 = vadd.f32 %v608_v62, %v586_v63  ;;  %v800_v1 = vpop.f32.mrb[5].mxu0 }
 0x209   :  { %v590_v2 = vmax.f32 %v587_v0, 0.0 }
 0x20b   :  { %591 = vst [vmem:[#allocation5] sm:$0x3] %v590_v2 }
 0x20c   :  { %996 = shalt.err (!%p993_p12)
}
 0x20d   :  { %s997_s21 = scalar_lea.hbm %s1149_s5, 32 }
 0x20e   :  { %p998_p13 = scmp.ne.s32.totalorder %s1149_s5, %s997_s21  ;;  %p1001_p0 = scmp.lt.u32.totalorder %s997_s21, %s1149_s5 }
 0x210   :  { %p1003_p1 = pnand %p1001_p0, %p998_p13 }
 0x212   :  { %1006 = shalt.err (!%p1003_p1)
}
 0x213   :  { %601 = dma.vmem_to_hbm [thread:$0]  %s599_s17, 32, %s1149_s5, [#allocation4]  }
 0x214   :  { %1009 = dma.done.wait [#allocation4], 32  }
 0x215   :  { %1010 = vsyncadd [#allocation4], 4294967264 }
 0x216   :  { %605 = vsyncpa [#allocation3], 1 }
 0x217   :  { %606 = vsyncpa [#allocation4], 1 }

</bundles_post_ra>
